<compile_context>
chip_gen: v6e
topology: v6e:2x2x1
jax: 0.10.0
libtpu: 0.0.40
codegen_flags: <defaults>
</compile_context>

<pallas_src>
import functools

import jax
import jax.numpy as jnp
from jax import lax
from jax.experimental import pallas as pl
from jax.experimental.pallas import tpu as pltpu


def _locked_dropout_kernel(seed_ref, x_ref, o_ref, *, keep_prob, threshold, hidden):
    tS, B, tH = x_ref.shape

    # Global (s, h) coordinates of this tile.
    s0 = pl.program_id(0) * tS
    h0 = pl.program_id(1) * tH
    s_idx = lax.broadcasted_iota(jnp.int32, (tS, tH), 0) + s0
    h_idx = lax.broadcasted_iota(jnp.int32, (tS, tH), 1) + h0

    # Counter-based hash of (seed, s, h) -> uniform uint32 bits.
    seed = seed_ref[0].astype(jnp.uint32)
    v = s_idx.astype(jnp.uint32) * jnp.uint32(hidden) + h_idx.astype(jnp.uint32)
    v = v * jnp.uint32(0x9E3779B9) + seed
    v = v ^ (v >> 16)
    v = v * jnp.uint32(0x85EBCA6B)
    v = v ^ (v >> 13)
    v = v * jnp.uint32(0xC2B2AE35)
    v = v ^ (v >> 16)

    # Integer-threshold Bernoulli(keep_prob) + inverted-dropout scale (f32).
    keep = v < jnp.uint32(threshold)
    mask = jnp.where(keep, jnp.float32(1.0 / keep_prob), jnp.float32(0.0))

    x = x_ref[...]
    # mask is (tS, tH); broadcast over the batch (sublane) axis -> "locked".
    o_ref[...] = (x.astype(jnp.float32) * mask[:, None, :]).astype(o_ref.dtype)


def _choose_block(S, B, H, itemsize, target_tile_bytes=4 * 1024 * 1024):
    """Tile plan: lane-dense H tile, S tile sized to ~4 MiB per buffer."""
    if H % 128 == 0 and H > 2048:
        tH = 2048                      # large multiple of 128 -> unmasked stores
    else:
        tH = H                         # full dim (also covers H < 128 / unaligned)
    bytes_per_s_row = B * tH * itemsize
    tS = max(1, min(S, target_tile_bytes // max(1, bytes_per_s_row)))
    return int(tS), int(tH)


def locked_dropout(x, dropout, seed, training=True, *, block_s=None, block_h=None):
    """LockedDropout forward.  x: (S, B, H); mask shared across the batch dim."""
    if not training or dropout == 0.0:
        return x
    S, B, H = x.shape
    keep_prob = 1.0 - float(dropout)
    threshold = min(int(round(keep_prob * 2.0 ** 32)), 2 ** 32 - 1)

    tS_auto, tH_auto = _choose_block(S, B, H, x.dtype.itemsize)
    tS = min(int(block_s), S) if block_s is not None else tS_auto
    tH = min(int(block_h), H) if block_h is not None else tH_auto

    grid = (pl.cdiv(S, tS), pl.cdiv(H, tH))
    seed_arr = jnp.asarray([seed], dtype=jnp.int32)

    kernel = functools.partial(
        _locked_dropout_kernel,
        keep_prob=keep_prob, threshold=threshold, hidden=H)

    block = pl.BlockSpec((tS, B, tH), lambda i, j: (i, 0, j))
    return pl.pallas_call(
        kernel,
        out_shape=jax.ShapeDtypeStruct(x.shape, x.dtype),
        grid=grid,
        in_specs=[
            pl.BlockSpec(memory_space=pltpu.MemorySpace.SMEM),  # seed scalar
            block,                                              # x tile (VMEM)
        ],
        out_specs=block,
        input_output_aliases={1: 0},   # out may reuse x's HBM buffer
        compiler_params=pltpu.CompilerParams(
            dimension_semantics=("parallel", "parallel"),
            vmem_limit_bytes=32 * 1024 * 1024,
        ),
    )(seed_arr, x)


if __name__ == "__main__":
    key = jax.random.PRNGKey(0)
    S, B, H = 32, 4, 128          # (seq, batch, hidden) — small demo shape
    dropout = 0.25
    keep_prob = 1.0 - dropout

    x = jax.random.normal(key, (S, B, H), dtype=jnp.float32)

    # block_s=8 -> 4 grid steps along S, exercising tiling + per-tile mask bits.
    y = locked_dropout(x, dropout, seed=1234, training=True, block_s=8)
    y = jax.block_until_ready(y)

    # --- sanity checks of the LockedDropout semantics ---
    kept = (y != 0.0)
    # "locked": the keep/drop pattern is identical across the batch dimension
    assert bool(jnp.all(kept == kept[:, :1, :])), "mask not shared across batch"
    # kept elements are exactly x / keep_prob (computed in f32)
    assert bool(jnp.allclose(jnp.where(kept, y, 0.0),
                             jnp.where(kept, x / keep_prob, 0.0),
                             rtol=1e-5, atol=1e-6)), "kept values not scaled"
    # mask is not reused / periodic across S tiles
    assert not bool(jnp.all(kept == kept[:1, :, :])), "mask constant along seq"
    # roughly keep_prob fraction of positions survive
    frac = float(jnp.mean(kept.astype(jnp.float32)))
    assert abs(frac - keep_prob) < 0.1, f"keep fraction {frac} far from {keep_prob}"

    # eval mode and dropout=0 are the identity
    y_eval = jax.block_until_ready(locked_dropout(x, dropout, seed=1234, training=False))
    assert bool(jnp.all(y_eval == x))
    y_p0 = jax.block_until_ready(locked_dropout(x, 0.0, seed=1234, training=True))
    assert bool(jnp.all(y_p0 == x))

    print("KERNEL_OK")
</pallas_src>

<mosaic_0001>
module attributes {stable_mosaic.version = 11 : i64} {
  func.func @_locked_dropout_kernel(%arg0: i32, %arg1: i32, %arg2: memref<1xi32, #tpu.memory_space<smem>>, %arg3: memref<8x4x128xf32, #tpu.memory_space<vmem>>, %arg4: memref<8x4x128xf32, #tpu.memory_space<vmem>>) attributes {dimension_semantics = [#tpu.dimension_semantics<parallel>, #tpu.dimension_semantics<parallel>], iteration_bounds = array<i64: 4, 1>, scalar_prefetch = 0 : i64, scratch_operands = 0 : i64, tpu.core_type = #tpu.core_type<tc>, window_params = [{transform_indices = @transform_0, window_bounds = array<i64: 1>}, {transform_indices = @transform_1, window_bounds = array<i64: 8, 4, 128>}, {transform_indices = @transform_2, window_bounds = array<i64: 8, 4, 128>}]} {
    %c8_i32 = arith.constant 8 : i32
    %0 = arith.muli %arg0, %c8_i32 : i32
    %c128_i32 = arith.constant 128 : i32
    %1 = arith.muli %arg1, %c128_i32 : i32
    %2 = tpu.iota {dimensions = array<i32: 0>} : vector<8x128xi32>
    %3 = vector.broadcast %0 : i32 to vector<8x128xi32>
    %4 = arith.addi %2, %3 : vector<8x128xi32>
    %5 = tpu.iota {dimensions = array<i32: 1>} : vector<8x128xi32>
    %6 = vector.broadcast %1 : i32 to vector<8x128xi32>
    %7 = arith.addi %5, %6 : vector<8x128xi32>
    %c0 = arith.constant 0 : index
    %8 = memref.load %arg2[%c0] : memref<1xi32, #tpu.memory_space<smem>>
    %c128_i32_0 = arith.constant 128 : i32
    %9 = vector.broadcast %c128_i32_0 : i32 to vector<8x128xi32>
    %10 = arith.muli %4, %9 : vector<8x128xi32>
    %11 = arith.addi %10, %7 : vector<8x128xi32>
    %c-1640531527_i32 = arith.constant -1640531527 : i32
    %12 = vector.broadcast %c-1640531527_i32 : i32 to vector<8x128xi32>
    %13 = arith.muli %11, %12 : vector<8x128xi32>
    %14 = vector.broadcast %8 : i32 to vector<8x128xi32>
    %15 = arith.addi %13, %14 : vector<8x128xi32>
    %c16_i32 = arith.constant 16 : i32
    %16 = vector.broadcast %c16_i32 : i32 to vector<8x128xi32>
    %17 = arith.shrui %15, %16 : vector<8x128xi32>
    %18 = arith.xori %15, %17 : vector<8x128xi32>
    %c-2048144789_i32 = arith.constant -2048144789 : i32
    %19 = vector.broadcast %c-2048144789_i32 : i32 to vector<8x128xi32>
    %20 = arith.muli %18, %19 : vector<8x128xi32>
    %c13_i32 = arith.constant 13 : i32
    %21 = vector.broadcast %c13_i32 : i32 to vector<8x128xi32>
    %22 = arith.shrui %20, %21 : vector<8x128xi32>
    %23 = arith.xori %20, %22 : vector<8x128xi32>
    %c-1028477387_i32 = arith.constant -1028477387 : i32
    %24 = vector.broadcast %c-1028477387_i32 : i32 to vector<8x128xi32>
    %25 = arith.muli %23, %24 : vector<8x128xi32>
    %c16_i32_1 = arith.constant 16 : i32
    %26 = vector.broadcast %c16_i32_1 : i32 to vector<8x128xi32>
    %27 = arith.shrui %25, %26 : vector<8x128xi32>
    %28 = arith.xori %25, %27 : vector<8x128xi32>
    %c-1073741824_i32 = arith.constant -1073741824 : i32
    %29 = vector.broadcast %c-1073741824_i32 : i32 to vector<8x128xi32>
    %30 = arith.cmpi ult, %28, %29 : vector<8x128xi32>
    %cst = arith.constant 1.33333337 : f32
    %cst_2 = arith.constant 0.000000e+00 : f32
    %31 = vector.broadcast %cst : f32 to vector<8x128xf32>
    %32 = vector.broadcast %cst_2 : f32 to vector<8x128xf32>
    %33 = arith.select %30, %31, %32 : vector<8x128xi1>, vector<8x128xf32>
    %c0_3 = arith.constant 0 : index
    %c0_4 = arith.constant 0 : index
    %c0_5 = arith.constant 0 : index
    %34 = vector.load %arg3[%c0_3, %c0_4, %c0_5] : memref<8x4x128xf32, #tpu.memory_space<vmem>>, vector<8x4x128xf32>
    %35 = vector.shape_cast %33 : vector<8x128xf32> to vector<8x1x128xf32>
    %36 = vector.broadcast %35 : vector<8x1x128xf32> to vector<8x4x128xf32>
    %37 = arith.mulf %34, %36 : vector<8x4x128xf32>
    %c0_6 = arith.constant 0 : index
    %c0_7 = arith.constant 0 : index
    %c0_8 = arith.constant 0 : index
    %38 = vector.load %arg4[%c0_6, %c0_7, %c0_8] : memref<8x4x128xf32, #tpu.memory_space<vmem>>, vector<8x4x128xf32>
    tpu.vector_store %arg4[%c0_6, %c0_7, %c0_8], %37 {strides = array<i32>} : memref<8x4x128xf32, #tpu.memory_space<vmem>>, vector<8x4x128xf32>,
    return
  }
  func.func @transform_0(%arg0: i32, %arg1: i32) -> i32 {
    %c0_i32 = arith.constant 0 : i32
    %c0_i32_0 = arith.constant 0 : i32
    return %c0_i32 : i32
  }
  func.func @transform_1(%arg0: i32, %arg1: i32) -> (i32, i32, i32) {
    %c0_i32 = arith.constant 0 : i32
    %c0_i32_0 = arith.constant 0 : i32
    return %arg0, %c0_i32, %arg1 : i32, i32, i32
  }
  func.func @transform_2(%arg0: i32, %arg1: i32) -> (i32, i32, i32) {
    %c0_i32 = arith.constant 0 : i32
    %c0_i32_0 = arith.constant 0 : i32
    return %arg0, %c0_i32, %arg1 : i32, i32, i32
  }
}

</mosaic_0001>

<bundles_post_ra>
// kernel: tpu_custom_call.1
= control target key start
LH: loop header
LB: loop body
LE: loop exit
PB: predicated region body
PF: predicated region fallthrough
CT: control target
= control target key end

     0   :  { %s803_s0 = inlined_call_operand.<no memory space> [shape: s32[1], index: 0, kind: input, shape index: {}]   ;;  %s804_s1 = inlined_call_operand.hbm [shape: f32[32,4,128], index: 1, kind: input, shape index: {}, may-alias: {1,2}]   ;;  %s805_s2 = inlined_call_operand.hbm [shape: f32[32,4,128], index: 2, kind: output, shape index: {}, may-alias: {1,2}]  }
   0x1   :  { %7 = sst [smem:[#allocation2]] %s803_s0 }
   0x2   :  { %8 = vsyncpa [#allocation4], 0 }
   0x3   :  { %10 = vsyncpa [#allocation4 + $0x1], 0 }
   0x4   :  { %11 = vsyncpa [#allocation5], 0 }
   0x5   :  { %13 = vsyncpa [#allocation5 + $0x1], 0  ;;  %s644_s11 = smov 0   ;;  %s646_s12 = smov 0  }
   0x6   :  { %s648_s13 = smov 0   ;;  %s650_s14 = smov 0  }
   0x7   :  { %s652_s15 = smov 0   ;;  %s654_s16 = smov 0  }
   0x8 LB: > { %s422_s0 = sadd.s32 4294967295, %s616_s16   ;;  %s423_s17 = sadd.s32 4294967294, %s616_s16   ;;  %s616_s16 = sphi %s654_s16, %s19_s16   ;;  %s612_s15 = sphi %s652_s15, %s815_s15   ;;  %s608_s14 = sphi %s650_s14, %s814_s14   ;;  %s604_s13 = sphi %s648_s13, %s813_s13   ;;  %s600_s12 = sphi %s646_s12, %s812_s12   ;;  %s596_s11 = sphi %s644_s11, %s811_s11  }
   0x9   : > { %s31_s18 = sadd.s32 1, %s612_s15  ;;  %s61_s19 = sadd.s32 1, %s604_s13 }
   0xa   : > { %p33_p0 = scmp.ge.s32.totalorder %s31_s18, 4  ;;  %p68_p1 = scmp.ne.s32.totalorder %s604_s13, %s600_s12 }
   0xb   : > { %p69_p2 = scmp.eq.s32.totalorder %s616_s16, 0  ;;  %p74_p3 = scmp.ne.s32.totalorder %s600_s12, %s596_s11 }
   0xc   : > { %s817_s18 = smov (%p33_p0, %s31_s18), 0  ;;  %p75_p5 = scmp.eq.s32.totalorder %s422_s0, 0 }
   0xd   : > { %p685_p4 = por %p69_p2, %p68_p1  ;;  %s56_s21 = ssub.s32 %s612_s15, %s817_s18 }
   0xe   : > { %p100_p6 = scmp.eq.s32.totalorder %s422_s0, 3  ;;  %p59_p7 = scmp.eq.s32.totalorder %s56_s21, 0 }
   0xf   : > { %p691_p8 = por %p75_p5, %p74_p3  ;;  %p106_p10 = scmp.eq.s32.totalorder %s423_s17, 3 }
  0x10   : > { %p695_p9 = por %p100_p6, %p68_p1  ;;  %p452_p12 = scmp.lt.s32.totalorder %s616_s16, 4 }
  0x11   : > { %s700_s24 = scalar_select %p59_p7, %s604_s13, %s61_s19  }
  0x12   : > { %p702_p11 = por %p106_p10, %p74_p3  ;;  %s129_s26 = sand.u32 1, %s604_s13  }
  0x13   : > { %s426_s27 = sshll.u32 %s129_s26, 5  ;;  %s438_s28 = sshll.u32 %s612_s15, 9 }
  0x14   : > { %s140_s3 = scalar_lea.hbm %s804_s1, %s438_s28  ;;  %s133_s4 = scalar_lea.vmem [#allocation3], %s426_s27 }
  0x15   : > { %s141_s5 = sshll.u32 %s133_s4, 4  ;;  %p714_p13 = pnand %p452_p12, %p685_p4  ;;  %s142_s5 = int_to_ptr.vmem [resolvable:$true] %s141_s5 }
  0x16   : > { %p429_p0 = scmp.ge.s32.totalorder %s616_s16, 1  ;;  %s130_s7 = scalar_lea.sflag [#allocation4], %s129_s26 }
  0x17   : > { %p510_p1 = pneg %p714_p13  ;;  %s521_s8 = scalar_lea.vmem %s142_s5, 512 }
  0x18   : > { %p522_p2 = scmp.ne.s32.totalorder %s142_s5, %s521_s8  ;;  %s618_s9 = smov [#allocation3]  }
  0x19   : > { %s526_s10 = sshll.u32 %s618_s9, 4  ;;  %s527_s10 = int_to_ptr.vmem [resolvable:$false] %s526_s10 }
  0x1a   : > { %p524_p3 = pnand %p522_p2, %p510_p1  ;;  %s528_s0 = scalar_lea.vmem %s527_s10, 1024 }
  0x1b   : > { %p529_p6 = scmp.lt.s32.totalorder %s142_s5, %s527_s10  ;;  %p530_p7 = scmp.lt.s32.totalorder %s528_s0, %s521_s8 }
  0x1c   : > { %p525_p5 = pneg %p524_p3 }
  0x1d   : > { %p531_p10 = por %p530_p7, %p529_p6 }
  0x1f   : > { %p532_p4 = pnand %p531_p10, %p525_p5 }
  0x21   : > { %535 = shalt.err (!%p532_p4)
}
  0x22   : > { %s619_s17 = smov 64   ;;  %s620_s19 = smov 4  }
  0x23   : > { %447 = dma.hbm_to_vmem [thread:$0]  (!%p714_p13), %s140_s3, 512, %s142_s5, %s130_s7, %s619_s17, %s619_s17, %s620_s19  }
  0x24   : > { %p149_p12 = scmp.lt.s32.totalorder %s616_s16, 5 }
  0x26   : > { %p150_p1 = pnand %p429_p0, %p149_p12 }
  0x27   : > { %s727_s20 = sand.u32 (!%p150_p1), 1, %s600_s12  }
  0x28   : > { %153 = sbr.rel (%p150_p1) target bundleno = 107 (0x6b), region = 28  ;;  %s430_s21 = sshll.u32 (!%p150_p1), %s727_s20, 5 }
  0x29   : > { %s156_s26 = scalar_lea.sflag (!%p150_p1), [#allocation4], %s727_s20  ;;  %s733_s27 = scalar_lea.vmem (!%p150_p1), [#allocation3], %s430_s21 }
  0x2d   : > { %587 = dma.done.wait (%p691_p8), %s156_s26, 512  }
  0x2e   : > { %589 = vsyncadd (%p691_p8), %s156_s26, 4294966784  ;;  %s432_s28 = sshll.u32 %s608_s14, 3  ;;  %v184_v0 = vlaneseq  ;;  %s192_s29 = sld [smem:[#allocation2]]  ;;  %v621_v14 = vmov 1966171168   ;;  %v622_v22 = vmov 0.0  }
  0x2f   : > { %v186_v1 = vstv %s432_s28  ;;  %v219_v15 = vunpack.c.l.s4 %v621_v14  ;;  %v208_v30 = vld [vmem:[%s733_s27] sm:$0xf]  ;;  %v209_v35 = vld [vmem:[%s733_s27 + $0x4] sm:$0xf]  ;;  %v210_v36 = vld [vmem:[%s733_s27 + $0x8] sm:$0xf] }
  0x30   : > { %v185_v2 = vshrl.u32 %v184_v0, 7  ;;  %v189_v4 = vand.u32 127, %v184_v0  ;;  %v212_v42 = vld [vmem:[%s733_s27 + $0x10] sm:$0xf]  ;;  %v211_v43 = vld [vmem:[%s733_s27 + $0xc] sm:$0xf] }
  0x31   : > { %v220_v18 = vunpack.c.0.s8 %v219_v15  ;;  %s179_s22 = scalar_lea.vmem [#allocation6], %s430_s21  ;;  %v213_v50 = vld [vmem:[%s733_s27 + $0x14] sm:$0xf]  ;;  %v214_v51 = vld [vmem:[%s733_s27 + $0x18] sm:$0xf]  ;;  %s439_s3 = sshll.u32 %s608_s14, 9 }
  0x32   : > { %v187_v3 = vadd.s32 %v186_v1, %v185_v2  ;;  %v268_v25 = vsub.s32 0, %v185_v2  ;;  %s337_s30 = sshll.u32 %s179_s22, 4  ;;  %v215_v57 = vld [vmem:[%s733_s27 + $0x1c] sm:$0xf]  ;;  %s756_s6 = scalar_lea.hbm %s805_s2, %s439_s3  ;;  %s751_s30 = int_to_ptr.vmem [resolvable:$true] %s337_s30 }
  0x33   : > { %v223_v21 = vsub.s32 %v220_v18, %v185_v2  ;;  %s323_s14 = scalar_lea.sflag [#allocation5], %s727_s20  ;;  %s536_s7 = scalar_lea.vmem %s751_s30, 512 }
  0x34   : > { %v193_v5 = vmul.u32 128, %v187_v3  ;;  %v196_v7 = vstv %s192_s29  ;;  %p537_p8 = scmp.ne.s32.totalorder %s751_s30, %s536_s7  ;;  %s623_s8 = smov [#allocation6]  }
  0x35   : > { %s540_s9 = sshll.u32 %s623_s8, 4  ;;  %s541_s9 = int_to_ptr.vmem [resolvable:$false] %s540_s9 }
  0x36   : > { %v194_v6 = vadd.s32 %v193_v5, %v189_v4  ;;  %p538_p13 = pnand %p537_p8, %p695_p9  ;;  %s542_s10 = scalar_lea.vmem %s541_s9, 1024 }
  0x37   : > { %p543_p2 = scmp.lt.s32.totalorder %s751_s30, %s541_s9  ;;  %p544_p3 = scmp.lt.s32.totalorder %s542_s10, %s536_s7 }
  0x38   : > { %v195_v8 = vmul.u32 2654435769, %v194_v6  ;;  %p539_p0 = pneg %p538_p13 }
  0x39   : > { %p545_p5 = por %p544_p3, %p543_p2 }
  0x3a   : > { %v197_v9 = vadd.s32 %v196_v7, %v195_v8 }
  0x3b   : > { %p546_p6 = pnand %p545_p5, %p539_p0 }
  0x3c   : > { %v198_v10 = vshrl.u32 %v197_v9, 16 }
  0x3e   : > { %v199_v11 = vxor.u32 %v198_v10, %v197_v9 }
  0x40   : > { %v200_v12 = vmul.u32 2246822507, %v199_v11 }
  0x42   : > { %v201_v13 = vshrl.u32 %v200_v12, 13 }
  0x44   : > { %v202_v16 = vxor.u32 %v201_v13, %v200_v12 }
  0x46   : > { %v203_v17 = vmul.u32 3266489909, %v202_v16 }
  0x48   : > { %v204_v19 = vshrl.u32 %v203_v17, 16 }
  0x4a   : > { %v205_v20 = vxor.u32 %v204_v19, %v203_v17 }
  0x4c   : > { %vm206_vm0 = vcmp.lt.u32.totalorder %v205_v20, 3221225472 }
  0x4d   : > { %v207_v23 = vsel %vm206_vm0, 1.3333334, %v622_v22 }
  0x4e   : > { %v224_v24 = vrot.slane %v207_v23, %v223_v21  ;;  %v217_v26 = vcombine.high %v207_v23, %v207_v23 }
  0x50   : > { %v240_v27 = vrot.slane %v224_v24, %v223_v21  ;;  %v232_v28 = vcombine.high %v224_v24, %v224_v24  ;;  %v231_v29 = vrot.slane %v217_v26, %v223_v21 }
  0x52   : > { %v269_v31 = vrot.slane %v240_v27, %v268_v25  ;;  %v254_v32 = vrot.slane %v232_v28, %v223_v21  ;;  %v262_v33 = vcombine.high %v240_v27, %v240_v27  ;;  %v247_v34 = vrot.slane %v231_v29, %v223_v21 }
  0x53   : > { %v233_v37 = vcombine.high %v231_v29, %v231_v29 }
  0x54   : > { %v306_v38 = vmul.f32 %v269_v31, %v208_v30  ;;  %v273_v39 = vrot.slane %v254_v32, %v268_v25  ;;  %v277_v40 = vrot.slane %v262_v33, %v268_v25  ;;  %v264_v41 = vcombine.high %v254_v32, %v254_v32 }
  0x55   : > { %v285_v44 = vrot.slane %v247_v34, %v268_v25  ;;  %v261_v45 = vrot.slane %v233_v37, %v223_v21  ;;  %v263_v46 = vcombine.high %v247_v34, %v247_v34 }
  0x56   : > { %314 = vst [vmem:[%s179_s22] sm:$0xf] %v306_v38  ;;  %v307_v47 = vmul.f32 %v273_v39, %v209_v35  ;;  %v308_v48 = vmul.f32 %v277_v40, %v210_v36  ;;  %v281_v49 = vrot.slane %v264_v41, %v268_v25 }
  0x57   : > { %v310_v52 = vmul.f32 %v285_v44, %v212_v42  ;;  %v289_v53 = vrot.slane %v261_v45, %v268_v25  ;;  %v293_v54 = vrot.slane %v263_v46, %v268_v25  ;;  %v265_v55 = vcombine.high %v261_v45, %v261_v45 }
  0x58   : > { %315 = vst [vmem:[%s179_s22 + $0x4] sm:$0xf] %v307_v47  ;;  %316 = vst [vmem:[%s179_s22 + $0x8] sm:$0xf] %v308_v48  ;;  %v309_v56 = vmul.f32 %v281_v49, %v211_v43 }
  0x59   : > { %318 = vst [vmem:[%s179_s22 + $0x10] sm:$0xf] %v310_v52  ;;  %v311_v58 = vmul.f32 %v289_v53, %v213_v50  ;;  %v312_v59 = vmul.f32 %v293_v54, %v214_v51  ;;  %v297_v60 = vrot.slane %v265_v55, %v268_v25 }
  0x5a   : > { %317 = vst [vmem:[%s179_s22 + $0xc] sm:$0xf] %v309_v56 }
  0x5b   : > { %319 = vst [vmem:[%s179_s22 + $0x14] sm:$0xf] %v311_v58  ;;  %320 = vst [vmem:[%s179_s22 + $0x18] sm:$0xf] %v312_v59  ;;  %v313_v61 = vmul.f32 %v297_v60, %v215_v57 }
  0x5d   : > { %321 = vst [vmem:[%s179_s22 + $0x1c] sm:$0xf] %v313_v61 }
  0x5e   : > { %549 = shalt.err (!%p546_p6)
}
  0x5f   : > { %s550_s0 = scalar_lea.hbm %s756_s6, 512  ;;  %s554_s21 = scalar_lea.hbm %s805_s2, 2048 }
  0x60   : > { %p551_p7 = scmp.ne.s32.totalorder %s756_s6, %s550_s0  ;;  %p555_p12 = scmp.lt.s32.totalorder %s756_s6, %s805_s2 }
  0x61   : > { %p556_p1 = scmp.lt.s32.totalorder %s554_s21, %s550_s0 }
  0x62   : > { %p552_p10 = pnand %p551_p7, %p695_p9 }
  0x63   : > { %p557_p8 = por %p556_p1, %p555_p12 }
  0x64   : > { %p553_p4 = pneg %p552_p10 }
  0x66   : > { %p558_p13 = pnand %p557_p8, %p553_p4 }
  0x68   : > { %561 = shalt.err (!%p558_p13)
}
  0x69   : > { %s624_s28 = smov 64   ;;  %s625_s29 = smov 4  }
  0x6a   : > { %442 = dma.vmem_to_hbm [thread:$0]  (%p695_p9), %s751_s30, 512, %s756_s6, %s323_s14, %s624_s28, %s624_s28, %s625_s29  }
  0x6b PF: > { %p453_p0 = scmp.ge.s32.totalorder %s616_s16, 2  ;;  %s352_s22 = sand.u32 1, %s596_s11  }
  0x6c   : > { %s353_s3 = scalar_lea.sflag [#allocation5], %s352_s22 }
  0x6d   : > { %p449_p2 = pnand %p453_p0, %p702_p11 }
  0x6f   : > { %p450_p3 = pneg %p449_p2 }
  0x71   : > { %591 = dma.done.wait (%p450_p3), %s353_s3, 512  }
  0x72   : > { %593 = vsyncadd (%p450_p3), %s353_s3, 4294966784  ;;  %s19_s16 = sadd.s32 1, %s616_s16   ;;  %s811_s11 = smov %s600_s12 }
  0x73   : > { %p16_p5 = scmp.ge.s32.totalorder %s19_s16, 6   ;;  %s812_s12 = smov %s604_s13 }
  0x74   : > { %s813_s13 = smov %s700_s24  ;;  %s814_s14 = smov %s612_s15 }
  0x75   : > { %s815_s15 = smov %s817_s18  ;;  %18 = sbr.rel (!%p16_p5) target bundleno = 8 (0x8), region = 73 }
  0x7a   :  { %358 = vsyncpa [#allocation4], 1 }
  0x7b   :  { %360 = vsyncpa [#allocation4 + $0x1], 1 }
  0x7c   :  { %361 = vsyncpa [#allocation5], 1 }
  0x7d   :  { %363 = vsyncpa [#allocation5 + $0x1], 1 }

</bundles_post_ra>
